<compile_context>
chip_gen: v5e
topology: v5e:2x2
jax: 0.10.0
libtpu: 0.0.40
codegen_flags: <defaults>
</compile_context>

<pallas_src>
import functools

import jax
import jax.numpy as jnp
from jax import lax
from jax.experimental import pallas as pl
from jax.experimental.pallas import tpu as pltpu


_LANES = 128
_MAX_LANES = 2048
_CHUNK_BYTES = 8 * 1024 * 1024            # per-DMA chunk (no VMEM involved)
_N_OUTSTANDING = 4                        # concurrent in-flight DMA descriptors
_MIN_SUBLANES = {4: 8, 2: 16, 1: 32}      # dtype itemsize -> sublane multiple
_MIN_MATERIALIZE_BYTES = 1 << 20          # below this a kernel launch dominates


def _pick_lanes(n: int) -> int:
    """Widest lane count (multiple of 128, <= _MAX_LANES) that divides n."""
    lanes = _LANES
    while lanes * 2 <= _MAX_LANES and n % (lanes * 2) == 0:
        lanes *= 2
    return lanes


def _dma_copy_kernel(x_hbm, o_hbm, sems, *, chunk_rows, full_chunks,
                     tail_rows, n_outstanding):
    """Chunked HBM->HBM copy with up to `n_outstanding` in-flight DMAs."""

    def chunk_copy(c, slot):
        sl = pl.ds(c * chunk_rows, chunk_rows)
        return pltpu.make_async_copy(x_hbm.at[sl, :], o_hbm.at[sl, :],
                                     sems.at[slot])

    def tail_copy():
        sl = pl.ds(full_chunks * chunk_rows, tail_rows)
        return pltpu.make_async_copy(x_hbm.at[sl, :], o_hbm.at[sl, :],
                                     sems.at[n_outstanding])

    # The (at most one) ragged tail goes out first on its own semaphore slot
    # so it overlaps with all the full-size chunks.
    if tail_rows > 0:                       # static Python branch
        tail_copy().start()

    # Prime the pipeline with the first `n_outstanding` full chunks.
    for c in range(min(n_outstanding, full_chunks)):        # static unroll (<=4)
        chunk_copy(c, c).start()

    # Steady state: wait chunk c, immediately start chunk c + n_outstanding.
    def body(c, carry):
        slot = c % n_outstanding
        chunk_copy(c, slot).wait()

        @pl.when(c + n_outstanding < full_chunks)
        def _():
            chunk_copy(c + n_outstanding, slot).start()

        return carry

    lax.fori_loop(0, full_chunks, body, 0)

    if tail_rows > 0:
        tail_copy().wait()


def _pallas_dma_copy_2d(x2d: jax.Array) -> jax.Array:
    """Identity-copy a (rows, lanes) array as a chunked HBM->HBM DMA."""
    rows, lanes = x2d.shape
    itemsize = jnp.dtype(x2d.dtype).itemsize
    min_rows = _MIN_SUBLANES.get(itemsize, 8)

    # ~8 MiB chunks; chunk starts stay sublane-aligned.
    target_rows = max(min_rows, _CHUNK_BYTES // (lanes * itemsize))
    target_rows = (target_rows // min_rows) * min_rows
    chunk_rows = min(rows, target_rows)

    full_chunks = rows // chunk_rows
    tail_rows = rows - full_chunks * chunk_rows

    kernel = functools.partial(
        _dma_copy_kernel,
        chunk_rows=chunk_rows,
        full_chunks=full_chunks,
        tail_rows=tail_rows,
        n_outstanding=_N_OUTSTANDING,
    )

    nbytes = rows * lanes * itemsize
    return pl.pallas_call(
        kernel,
        out_shape=jax.ShapeDtypeStruct((rows, lanes), x2d.dtype),
        in_specs=[pl.BlockSpec(memory_space=pl.ANY)],
        out_specs=pl.BlockSpec(memory_space=pl.ANY),
        scratch_shapes=[pltpu.SemaphoreType.DMA((_N_OUTSTANDING + 1,))],
        cost_estimate=pl.CostEstimate(flops=0, transcendentals=0,
                                      bytes_accessed=2 * nbytes),
    )(x2d)


class Reshape:
    """JAX/Pallas equivalent of the PyTorch WaveGAN Reshape module.

    Default path is metadata-only (== torch ``.view``, zero HBM traffic).
    Set ``materialize=True`` to force the data through the Pallas HBM->HBM
    DMA copy kernel and obtain a distinct output buffer.

    Fallbacks to the metadata path (both exact by reshape semantics):
      * numel % 128 != 0
      * total bytes < ``min_materialize_bytes`` (kernel launch would dominate)
    """

    def __init__(self, shape, materialize: bool = False,
                 min_materialize_bytes: int = _MIN_MATERIALIZE_BYTES):
        self.shape = tuple(shape)
        self.materialize = materialize
        self.min_materialize_bytes = int(min_materialize_bytes)

    def __call__(self, x: jax.Array) -> jax.Array:
        out = x.reshape(self.shape)        # metadata-only, row-major == .view()
        if not self.materialize:
            return out

        n = x.size
        nbytes = n * jnp.dtype(x.dtype).itemsize
        if n % _LANES != 0 or nbytes < self.min_materialize_bytes:
            return out

        lanes = _pick_lanes(n)
        flat2d = x.reshape(n // lanes, lanes)
        copied = _pallas_dma_copy_2d(flat2d)
        return copied.reshape(self.shape)


if __name__ == "__main__":
    key = jax.random.PRNGKey(0)
    # Small example consistent with WaveGAN usage: flatten NCHW feature map
    # (2, 4, 16, 16) -> (2, 1024).
    x = jax.random.normal(key, (2, 4, 16, 16), dtype=jnp.float32)
    target_shape = (2, 4 * 16 * 16)

    ref = jax.block_until_ready(x.reshape(target_shape))

    # Recommended path: metadata-only reshape (no HBM traffic).
    out_meta = jax.block_until_ready(Reshape(target_shape)(x))

    # Materializing path: exercise the Pallas DMA-copy kernel once.
    # (min_materialize_bytes=0 overrides the tiny-input short-circuit so the
    #  demo-sized input actually runs the kernel.)
    out_kern = jax.block_until_ready(
        Reshape(target_shape, materialize=True, min_materialize_bytes=0)(x))

    assert out_meta.shape == target_shape, (out_meta.shape, target_shape)
    assert out_kern.shape == target_shape, (out_kern.shape, target_shape)
    assert out_kern.dtype == x.dtype
    assert bool(jnp.array_equal(out_meta, ref))
    assert bool(jnp.array_equal(out_kern, ref))

    print("KERNEL_OK")
</pallas_src>

<mosaic_0001>
module attributes {stable_mosaic.version = 11 : i64} {
  func.func @_dma_copy_kernel(%arg0: memref<1x2048xf32, #tpu.memory_space<any>>, %arg1: memref<1x2048xf32, #tpu.memory_space<any>>, %arg2: memref<5x!tpu.dma_semaphore, #tpu.memory_space<semaphore_mem>>) attributes {dimension_semantics = [], scalar_prefetch = 0 : i64, scratch_operands = 1 : i64, tpu.core_type = #tpu.core_type<tc>} {
    %c0_i32 = arith.constant 0 : i32
    %c0_i32_0 = arith.constant 0 : i32
    %c0_i32_1 = arith.constant 0 : i32
    %0 = tpu.memref_slice %arg0[%c0_i32_0, %c0_i32_1] : memref<1x2048xf32, #tpu.memory_space<any>> -> memref<1x2048xf32, #tpu.memory_space<any>>
    %c0_i32_2 = arith.constant 0 : i32
    %c0_i32_3 = arith.constant 0 : i32
    %1 = tpu.memref_slice %arg1[%c0_i32_2, %c0_i32_3] : memref<1x2048xf32, #tpu.memory_space<any>> -> memref<1x2048xf32, #tpu.memory_space<any>>
    %2 = tpu.memref_slice %arg2[%c0_i32] : memref<5x!tpu.dma_semaphore, #tpu.memory_space<semaphore_mem>> -> memref<1x!tpu.dma_semaphore, #tpu.memory_space<semaphore_mem>>
    %3 = tpu.memref_squeeze %2 : memref<1x!tpu.dma_semaphore, #tpu.memory_space<semaphore_mem>> -> memref<!tpu.dma_semaphore, #tpu.memory_space<semaphore_mem>>
    tpu.enqueue_dma source(%0 : memref<1x2048xf32, #tpu.memory_space<any>>) target(%1 : memref<1x2048xf32, #tpu.memory_space<any>>) target_semaphore(%3 : memref<!tpu.dma_semaphore, #tpu.memory_space<semaphore_mem>>)
    %c0_i32_4 = arith.constant 0 : i32
    %c4_i32 = arith.constant 4 : i32
    %c0_i32_5 = arith.constant 0 : i32
    %4 = arith.cmpi eq, %c4_i32, %c0_i32_5 : i32
    %c1_i32 = arith.constant 1 : i32
    %5 = arith.select %4, %c1_i32, %c4_i32 : i32
    %6 = arith.remsi %c0_i32_4, %5 : i32
    %c0_i32_6 = arith.constant 0 : i32
    %7 = arith.cmpi ne, %6, %c0_i32_6 : i32
    %c0_i32_7 = arith.constant 0 : i32
    %8 = arith.cmpi slt, %6, %c0_i32_7 : i32
    %c0_i32_8 = arith.constant 0 : i32
    %9 = arith.cmpi slt, %5, %c0_i32_8 : i32
    %10 = arith.xori %8, %9 : i1
    %11 = arith.andi %10, %7 : i1
    %12 = arith.addi %6, %5 : i32
    %13 = arith.select %11, %12, %6 : i32
    %c1_i32_9 = arith.constant 1 : i32
    %14 = arith.muli %c0_i32_4, %c1_i32_9 : i32
    %c0_i32_10 = arith.constant 0 : i32
    %15 = tpu.memref_slice %arg0[%14, %c0_i32_10] : memref<1x2048xf32, #tpu.memory_space<any>> -> memref<1x2048xf32, #tpu.memory_space<any>>
    %c0_i32_11 = arith.constant 0 : i32
    %16 = tpu.memref_slice %arg1[%14, %c0_i32_11] : memref<1x2048xf32, #tpu.memory_space<any>> -> memref<1x2048xf32, #tpu.memory_space<any>>
    %17 = tpu.memref_slice %arg2[%13] : memref<5x!tpu.dma_semaphore, #tpu.memory_space<semaphore_mem>> -> memref<1x!tpu.dma_semaphore, #tpu.memory_space<semaphore_mem>>
    %18 = tpu.memref_squeeze %17 : memref<1x!tpu.dma_semaphore, #tpu.memory_space<semaphore_mem>> -> memref<!tpu.dma_semaphore, #tpu.memory_space<semaphore_mem>>
    tpu.wait_dma2 semaphore(%18 : memref<!tpu.dma_semaphore, #tpu.memory_space<semaphore_mem>>) src(%15 : memref<1x2048xf32, #tpu.memory_space<any>>) dst(%16 : memref<1x2048xf32, #tpu.memory_space<any>>)
    %c4_i32_12 = arith.constant 4 : i32
    %19 = arith.addi %c0_i32_4, %c4_i32_12 : i32
    %c1_i32_13 = arith.constant 1 : i32
    %20 = arith.cmpi slt, %19, %c1_i32_13 : i32
    %21 = arith.extui %20 : i1 to i32
    %c0_i32_14 = arith.constant 0 : i32
    %22 = arith.cmpi ne, %21, %c0_i32_14 : i32
    scf.if %22 {
      %c4_i32_16 = arith.constant 4 : i32
      %23 = arith.addi %c0_i32_4, %c4_i32_16 : i32
      %c1_i32_17 = arith.constant 1 : i32
      %24 = arith.muli %23, %c1_i32_17 : i32
      %c0_i32_18 = arith.constant 0 : i32
      %25 = tpu.memref_slice %arg0[%24, %c0_i32_18] : memref<1x2048xf32, #tpu.memory_space<any>> -> memref<1x2048xf32, #tpu.memory_space<any>>
      %c0_i32_19 = arith.constant 0 : i32
      %26 = tpu.memref_slice %arg1[%24, %c0_i32_19] : memref<1x2048xf32, #tpu.memory_space<any>> -> memref<1x2048xf32, #tpu.memory_space<any>>
      %27 = tpu.memref_slice %arg2[%13] : memref<5x!tpu.dma_semaphore, #tpu.memory_space<semaphore_mem>> -> memref<1x!tpu.dma_semaphore, #tpu.memory_space<semaphore_mem>>
      %28 = tpu.memref_squeeze %27 : memref<1x!tpu.dma_semaphore, #tpu.memory_space<semaphore_mem>> -> memref<!tpu.dma_semaphore, #tpu.memory_space<semaphore_mem>>
      tpu.enqueue_dma source(%25 : memref<1x2048xf32, #tpu.memory_space<any>>) target(%26 : memref<1x2048xf32, #tpu.memory_space<any>>) target_semaphore(%28 : memref<!tpu.dma_semaphore, #tpu.memory_space<semaphore_mem>>)
    } else {
    }
    %c1_i32_15 = arith.constant 1 : i32
    return
  }
}

</mosaic_0001>

<bundles_post_ra>
// kernel: tpu_custom_call.1
= control target key start
LH: loop header
LB: loop body
LE: loop exit
PB: predicated region body
PF: predicated region fallthrough
CT: control target
= control target key end

     0   :  { %s64_s12 = smov [#allocation2]   ;;  %s65_s13 = smov [#allocation3]   ;;  %s83_s0 = inlined_call_operand.hbm [shape: f32[1,2048], index: 0, kind: input, shape index: {}]   ;;  %s84_s1 = inlined_call_operand.hbm [shape: f32[1,2048], index: 1, kind: output, shape index: {}]  }
   0x1   :  { %s10_s8 = sshll.u32 %s83_s0, 4  ;;  %s12_s11 = sshll.u32 %s84_s1, 4  ;;  %s11_s8 = int_to_ptr.hbm [resolvable:$true] %s10_s8  ;;  %s13_s11 = int_to_ptr.hbm [resolvable:$true] %s12_s11 }
   0x2   :  { %s66_s14 = smov 0  }
   0x3   :  { %16 = dma.general %s11_s8, 256, %s13_s11, %s64_s12, %s65_s13, [#allocation4], %s66_s14, 0  }
   0x4   :  { %62 = dma.done.wait [#allocation2], 256 }
   0x5   :  { %63 = vsyncadd [#allocation2], 4294967040 }
   0x6   :  { %20 = vsyncmov [#allocation2] }
   0x9   :  { %s21_s15 = vpop.sfrf %20 }
   0xa   :  { %p54_p0 = scmp.ne.s32.totalorder %s21_s15, 0 }
   0xc   :  { %25 = shalt.err (%p54_p0)  }
   0xd   :  { %27 = vsyncmov [#allocation2 + $0x1] }
  0x10   :  { %s28_s16 = vpop.sfrf %27 }
  0x11   :  { %p55_p1 = scmp.ne.s32.totalorder %s28_s16, 0 }
  0x13   :  { %32 = shalt.err (%p55_p1)  }
  0x14   :  { %34 = vsyncmov [#allocation2 + $0x2] }
  0x17   :  { %s35_s0 = vpop.sfrf %34 }
  0x18   :  { %p56_p2 = scmp.ne.s32.totalorder %s35_s0, 0 }
  0x1a   :  { %39 = shalt.err (%p56_p2)  }
  0x1b   :  { %41 = vsyncmov [#allocation2 + $0x3] }
  0x1e   :  { %s42_s1 = vpop.sfrf %41 }
  0x1f   :  { %p57_p3 = scmp.ne.s32.totalorder %s42_s1, 0 }
  0x21   :  { %46 = shalt.err (%p57_p3)  }
  0x22   :  { %48 = vsyncmov [#allocation2 + $0x4] }
  0x25   :  { %s49_s17 = vpop.sfrf %48 }
  0x26   :  { %p58_p4 = scmp.ne.s32.totalorder %s49_s17, 0 }
  0x28   :  { %53 = shalt.err (%p58_p4)  }

</bundles_post_ra>
